<compile_context>
chip_gen: v7x
topology: tpu7x:2x2x1
jax: 0.10.0
libtpu: 0.0.40
codegen_flags: <defaults>
</compile_context>

<pallas_src>
import jax
import jax.numpy as jnp
from jax.experimental import pallas as pl
from jax.experimental.pallas import tpu as pltpu  # noqa: F401  (TPU backend)


def _linear_add_kernel(x_ref, w_ref, b_ref, other_ref, out_ref):
    # x_ref:     (1, in)     input row   (in_features on lanes)
    # w_ref:     (out, in)   torch-native Linear weight (out on sublanes, in on lanes)
    # b_ref:     (1, out)    Linear bias
    # other_ref: (rows, out) broadcast-added tensor
    # out_ref:   (rows, out)
    out_features = w_ref.shape[0]

    # y[o] = sum_k x[0, k] * w[o, k]   -- VPU multiply (x broadcasts over sublanes)
    prod = x_ref[...] * w_ref[...]                              # (out, in)
    y_col = jnp.sum(prod, axis=1, keepdims=True)                # (out, 1)  lane reduce

    # 3-element sublane -> lane move without jnp.transpose:
    # y_row[0, j] = sum_i (i == j) * y_col[i, 0]
    row_ids = jax.lax.broadcasted_iota(jnp.int32, (out_features, out_features), 0)
    col_ids = jax.lax.broadcasted_iota(jnp.int32, (out_features, out_features), 1)
    y_row = jnp.sum(
        jnp.where(row_ids == col_ids, y_col, jnp.zeros_like(y_col)),
        axis=0,
        keepdims=True,
    )                                                            # (1, out)

    # (x @ W.T + b) + other, broadcast over rows.
    out_ref[...] = (y_row + b_ref[...] + other_ref[...]).astype(out_ref.dtype)


@jax.jit
def model_forward(x, weight, bias, other):
    """Forward pass of the PyTorch Model.

    x:      (1, in_features)
    weight: (out_features, in_features)  -- torch.nn.Linear native layout (no transpose)
    bias:   (out_features,)
    other:  (rows, out_features)
    returns (rows, out_features)
    """
    rows, out_features = other.shape
    out_dtype = jnp.result_type(x.dtype, weight.dtype, bias.dtype, other.dtype)

    b_row = bias.reshape(1, out_features)  # metadata-only reshape, fused under jit

    return pl.pallas_call(
        _linear_add_kernel,
        out_shape=jax.ShapeDtypeStruct((rows, out_features), out_dtype),
        in_specs=[
            pl.BlockSpec(x.shape, lambda: (0, 0)),
            pl.BlockSpec(weight.shape, lambda: (0, 0)),
            pl.BlockSpec(b_row.shape, lambda: (0, 0)),
            pl.BlockSpec(other.shape, lambda: (0, 0)),
        ],
        out_specs=pl.BlockSpec((rows, out_features), lambda: (0, 0)),
    )(x, weight, b_row, other)


if __name__ == "__main__":
    key = jax.random.PRNGKey(0)
    k_x, k_w, k_b, k_o = jax.random.split(key, 4)

    in_features, out_features, rows = 42, 3, 2

    # Deterministic parameter init (PyTorch Linear default: U(-1/sqrt(in), 1/sqrt(in))).
    bound = 1.0 / (in_features ** 0.5)
    weight = jax.random.uniform(
        k_w, (out_features, in_features), jnp.float32, -bound, bound
    )
    bias = jax.random.uniform(k_b, (out_features,), jnp.float32, -bound, bound)

    # Inputs matching the PyTorch script.
    x = jax.random.normal(k_x, (1, in_features), jnp.float32)
    other = jax.random.normal(k_o, (rows, out_features), jnp.float32)

    out = jax.block_until_ready(model_forward(x, weight, bias, other))

    # Reference check in plain JAX (torch-layout weight).
    ref = (x @ weight.T + bias[None, :]) + other
    assert out.shape == (rows, out_features)
    assert jnp.allclose(out, ref, atol=1e-5, rtol=1e-5)

    print("KERNEL_OK")
</pallas_src>

<mosaic_0001>
module attributes {stable_mosaic.version = 11 : i64} {
  func.func @_linear_add_kernel(%arg0: memref<1x42xf32, #tpu.memory_space<vmem>>, %arg1: memref<3x42xf32, #tpu.memory_space<vmem>>, %arg2: memref<1x3xf32, #tpu.memory_space<vmem>>, %arg3: memref<2x3xf32, #tpu.memory_space<vmem>>, %arg4: memref<2x3xf32, #tpu.memory_space<vmem>>) attributes {dimension_semantics = [], scalar_prefetch = 0 : i64, scratch_operands = 0 : i64, tpu.core_type = #tpu.core_type<tc>} {
    %c0 = arith.constant 0 : index
    %c0_0 = arith.constant 0 : index
    %0 = vector.load %arg0[%c0, %c0_0] : memref<1x42xf32, #tpu.memory_space<vmem>>, vector<1x42xf32>
    %c0_1 = arith.constant 0 : index
    %c0_2 = arith.constant 0 : index
    %1 = vector.load %arg1[%c0_1, %c0_2] : memref<3x42xf32, #tpu.memory_space<vmem>>, vector<3x42xf32>
    %2 = vector.broadcast %0 : vector<1x42xf32> to vector<3x42xf32>
    %3 = arith.mulf %2, %1 : vector<3x42xf32>
    %cst = arith.constant dense<0.000000e+00> : vector<3xf32>
    %4 = vector.multi_reduction <add>, %3, %cst [1] : vector<3x42xf32> to vector<3xf32>
    %5 = vector.shape_cast %4 : vector<3xf32> to vector<3x1xf32>
    %6 = tpu.iota {dimensions = array<i32: 0>} : vector<3x3xi32>
    %7 = tpu.iota {dimensions = array<i32: 1>} : vector<3x3xi32>
    %8 = arith.cmpi eq, %6, %7 : vector<3x3xi32>
    %cst_3 = arith.constant 0.000000e+00 : f32
    %9 = vector.broadcast %cst_3 : f32 to vector<3x1xf32>
    %10 = vector.shape_cast %5 : vector<3x1xf32> to vector<3x1xf32>
    %11 = vector.broadcast %10 : vector<3x1xf32> to vector<3x3xf32>
    %12 = vector.shape_cast %9 : vector<3x1xf32> to vector<3x1xf32>
    %13 = vector.broadcast %12 : vector<3x1xf32> to vector<3x3xf32>
    %14 = arith.select %8, %11, %13 : vector<3x3xi1>, vector<3x3xf32>
    %cst_4 = arith.constant dense<0.000000e+00> : vector<3xf32>
    %15 = vector.multi_reduction <add>, %14, %cst_4 [0] : vector<3x3xf32> to vector<3xf32>
    %16 = vector.shape_cast %15 : vector<3xf32> to vector<1x3xf32>
    %c0_5 = arith.constant 0 : index
    %c0_6 = arith.constant 0 : index
    %17 = vector.load %arg2[%c0_5, %c0_6] : memref<1x3xf32, #tpu.memory_space<vmem>>, vector<1x3xf32>
    %18 = arith.addf %16, %17 : vector<1x3xf32>
    %c0_7 = arith.constant 0 : index
    %c0_8 = arith.constant 0 : index
    %19 = vector.load %arg3[%c0_7, %c0_8] : memref<2x3xf32, #tpu.memory_space<vmem>>, vector<2x3xf32>
    %20 = vector.broadcast %18 : vector<1x3xf32> to vector<2x3xf32>
    %21 = arith.addf %20, %19 : vector<2x3xf32>
    %c0_9 = arith.constant 0 : index
    %c0_10 = arith.constant 0 : index
    %22 = vector.load %arg4[%c0_9, %c0_10] : memref<2x3xf32, #tpu.memory_space<vmem>>, vector<2x3xf32>
    tpu.vector_store %arg4[%c0_9, %c0_10], %21 {strides = array<i32>} : memref<2x3xf32, #tpu.memory_space<vmem>>, vector<2x3xf32>,
    return
  }
}

</mosaic_0001>

<bundles_post_ra>
// kernel: model_forward.1
= control target key start
LH: loop header
LB: loop body
LE: loop exit
PB: predicated region body
PF: predicated region fallthrough
CT: control target
= control target key end

     0   :  { %vm27_vm0 = vcmask 337920   ;;  %s145_s0 = inlined_call_operand.vmem [shape: f32[1,42], index: 0, kind: input, shape index: {}]   ;;  %s146_s1 = inlined_call_operand.vmem [shape: f32[3,42], index: 1, kind: input, shape index: {}]   ;;  %s147_s2 = inlined_call_operand.vmem [shape: f32[1,3], index: 2, kind: input, shape index: {}]   ;;  %s148_s3 = inlined_call_operand.vmem [shape: f32[2,3], index: 3, kind: input, shape index: {}]   ;;  %s149_s4 = inlined_call_operand.hbm [shape: f32[2,3], index: 4, kind: output, shape index: {}]  }
   0x1   :  { %v69_v0 = vld [vmem:[%s145_s0] ss:$0 sm:$0xff] }
   0x2   :  { %v19_v1 = vld [vmem:[%s146_s1] sm:$0x7] }
   0x3   :  { %v26_v2 = vmul.f32 %v69_v0, %v19_v1 }
   0x4   :  { %9 = vsyncpa [#allocation3], 0  ;;  %v31_v4 = vlaneseq  ;;  %vm37_vm2 = vcmask 18432   ;;  %v45_v15 = vld [vmem:[%s147_s2] sm:$0x1]  ;;  %s95_s21 = smov [#allocation2]  }
   0x5   :  { %v28_v3 = vsel %vm27_vm0, %v26_v2, 0.0  ;;  %v47_v19 = vld [vmem:[%s148_s3] sm:$0x3]  ;;  %s61_s22 = sshll.u32 %s95_s21, 4  ;;  %vm53_vm3 = vcmask 17408   ;;  %s62_s22 = int_to_ptr.vmem [resolvable:$true] %s61_s22 }
   0x6   :  { %29 = vadd.xlane.f32.xlu0 %v28_v3  ;;  %v32_v5 = vshrl.u32 %v31_v4, 7  ;;  %v34_v6 = vand.u32 127, %v31_v4  ;;  %s71_s23 = scalar_lea.vmem %s62_s22, 32  ;;  %p76_p1 = scmp.lt.s32.totalorder %s62_s22, %s62_s22 }
   0x7   :  { %p72_p0 = scmp.ne.s32.totalorder %s62_s22, %s71_s23  ;;  %p77_p2 = scmp.lt.s32.totalorder %s71_s23, %s71_s23 }
   0x8   :  { %vm35_vm1 = vcmp.eq.s32.totalorder %v32_v5, %v34_v6  ;;  %v50_v17 = vsub.s32 0, %v32_v5 }
   0x9   :  { %p78_p3 = por %p77_p2, %p76_p1 }
   0xb   :  { %p79_p4 = pnand %p78_p3, %p72_p0 }
  0x93   :  { %v30_v7 = vpop.xlane.xlu0 %29 }
  0x94   :  { %v36_v8 = vsel %vm35_vm1, %v30_v7, 0.0 }
  0x95   :  { %v38_v9 = vsel %vm37_vm2, %v36_v8, 0.0 }
  0x96   :  { %v39_v10 = vrot.slane %v38_v9, 4 }
  0x98   :  { %v40_v11 = vadd.f32 %v39_v10, %v38_v9 }
  0x9a   :  { %v41_v12 = vrot.slane %v40_v11, 2 }
  0x9c   :  { %v42_v13 = vadd.f32 %v41_v12, %v40_v11 }
  0x9e   :  { %v43_v14 = vrot.slane %v42_v13, 1 }
  0xa0   :  { %v44_v16 = vadd.f32 %v43_v14, %v42_v13 }
  0xa2   :  { %v46_v18 = vadd.f32 %v45_v15, %v44_v16 }
  0xa4   :  { %v51_v20 = vrot.slane %v46_v18, %v50_v17 }
  0xa6   :  { %v52_v21 = vadd.f32 %v51_v20, %v47_v19 }
  0xa8   :  { %54 = vst.msk [vmem:[#allocation2] sm:$0x3] %vm53_vm3, %v52_v21 }
  0xa9   :  { %82 = shalt.err (!%p79_p4)
}
  0xaa   :  { %s83_s25 = scalar_lea.hbm %s149_s4, 32 }
  0xab   :  { %p84_p5 = scmp.ne.s32.totalorder %s149_s4, %s83_s25  ;;  %p87_p6 = scmp.lt.u32.totalorder %s83_s25, %s149_s4 }
  0xad   :  { %p89_p7 = pnand %p87_p6, %p84_p5 }
  0xaf   :  { %92 = shalt.err (!%p89_p7)
}
  0xb0   :  { %64 = dma.vmem_to_hbm [thread:$0]  %s62_s22, 32, %s149_s4, [#allocation3]  }
  0xb1   :  { %93 = dma.done.wait [#allocation3], 32  }
  0xb2   :  { %94 = vsyncadd [#allocation3], 4294967264 }
  0xb3   :  { %68 = vsyncpa [#allocation3], 1 }

</bundles_post_ra>
